<compile_context>
chip_gen: v5e
topology: v5e:2x2
jax: 0.10.0
libtpu: 0.0.40
codegen_flags: <defaults>
</compile_context>

<pallas_src>
import jax
import jax.numpy as jnp
from jax.experimental import pallas as pl
from jax.experimental.pallas import tpu as pltpu


def _round_up(n, m):
    return (n + m - 1) // m * m


def mlp_kernel(x_ref,
               w1_ref, b1_ref,
               w2_ref, b2_ref,
               w3_ref, b3_ref,
               w4_ref, b4_ref,
               o_ref):
    # x arrives in f32; cast to bf16 in-kernel so the wrapper has no extra
    # cast op and x only crosses HBM once at 4B/elem.
    x = x_ref[...].astype(jnp.bfloat16)

    h = jnp.dot(x, w1_ref[...], preferred_element_type=jnp.float32) + b1_ref[...]
    h = jnp.maximum(h, 0.0).astype(jnp.bfloat16)

    h = jnp.dot(h, w2_ref[...], preferred_element_type=jnp.float32) + b2_ref[...]
    h = jnp.maximum(h, 0.0).astype(jnp.bfloat16)

    h = jnp.dot(h, w3_ref[...], preferred_element_type=jnp.float32) + b3_ref[...]
    h = jnp.maximum(h, 0.0).astype(jnp.bfloat16)

    logits = jnp.dot(h, w4_ref[...], preferred_element_type=jnp.float32) + b4_ref[...]

    # Numerically-stable softmax over the class axis (PyTorch dim=1).
    # Exact normalization in f32: rows sum to 1 within f32 rounding.
    m = jnp.max(logits, axis=1, keepdims=True)
    e = jnp.exp(logits - m)
    s = jnp.sum(e, axis=1, keepdims=True)
    o_ref[...] = e / s


def cast_params(params):
    """One-time bf16 copies of the weights (biases stay f32)."""
    return [(w.astype(jnp.bfloat16), b) for (w, b) in params]


def mlp_forward(x, params_bf, *, block_batch=2048):
    """x: (batch, in_dim) f32. params_bf: output of cast_params."""
    (w1, b1), (w2, b2), (w3, b3), (w4, b4) = params_bf
    batch, in_dim = x.shape
    n_classes = w4.shape[1]

    # Batch tile: small batches -> single full tile; larger batches -> aim for
    # >=2 grid steps (so the "parallel" axis actually uses both v7x TCs),
    # rounded to a multiple of 16 for bf16 sublane packing, capped at
    # block_batch to stay comfortably inside scoped VMEM on every generation.
    if batch <= 16:
        tb = batch
    else:
        tb = min(block_batch, _round_up(pl.cdiv(batch, 2), 16))
    grid = (pl.cdiv(batch, tb),)

    def resident(arr):
        # Full-shape block, same block every grid step -> stays VMEM-resident.
        return pl.BlockSpec(arr.shape, lambda i: (0, 0))

    in_specs = [
        pl.BlockSpec((tb, in_dim), lambda i: (i, 0)),     # activations: pipelined
        resident(w1), resident(b1),
        resident(w2), resident(b2),
        resident(w3), resident(b3),
        resident(w4), resident(b4),
    ]
    out_specs = pl.BlockSpec((tb, n_classes), lambda i: (i, 0))

    return pl.pallas_call(
        mlp_kernel,
        out_shape=jax.ShapeDtypeStruct((batch, n_classes), jnp.float32),
        grid=grid,
        in_specs=in_specs,
        out_specs=out_specs,
        compiler_params=pltpu.CompilerParams(
            dimension_semantics=("parallel",)),   # batch axis over v7x's 2 TCs
    )(x, w1, b1, w2, b2, w3, b3, w4, b4)


def init_params(key, input_dim):
    """Deterministic init; weights stored as (in, out), biases as (1, out)."""
    sizes = [(input_dim, 50), (50, 50), (50, 20), (20, 5)]
    params = []
    for i, (fan_in, fan_out) in enumerate(sizes):
        kw, kb = jax.random.split(jax.random.fold_in(key, i))
        bound = 1.0 / jnp.sqrt(jnp.float32(fan_in))
        w = jax.random.uniform(kw, (fan_in, fan_out), jnp.float32, -bound, bound)
        b = jax.random.uniform(kb, (1, fan_out), jnp.float32, -bound, bound)
        params.append((w, b))
    return params


def reference_forward(x, params):
    """Reference with the same bf16-operand / f32-accumulate matmul recipe."""
    (w1, b1), (w2, b2), (w3, b3), (w4, b4) = params

    def dot_bf16(a, w):
        return jnp.dot(a.astype(jnp.bfloat16), w.astype(jnp.bfloat16),
                       preferred_element_type=jnp.float32)

    h = jnp.maximum(dot_bf16(x, w1) + b1, 0.0)
    h = jnp.maximum(dot_bf16(h, w2) + b2, 0.0)
    h = jnp.maximum(dot_bf16(h, w3) + b3, 0.0)
    logits = dot_bf16(h, w4) + b4
    return jax.nn.softmax(logits, axis=1)


if __name__ == "__main__":
    key = jax.random.PRNGKey(0)
    input_dim = 13   # heart-disease feature count
    batch = 8

    kx, kp = jax.random.split(key)
    x = jax.random.normal(kx, (batch, input_dim), jnp.float32)
    params = init_params(kp, input_dim)
    params_bf = cast_params(params)   # one-time bf16 weight copies

    out = mlp_forward(x, params_bf)
    jax.block_until_ready(out)

    ref = reference_forward(x, params)
    assert out.shape == (batch, 5)
    # bf16 matmuls -> compare at ~1e-3
    assert jnp.allclose(out, ref, atol=2e-3, rtol=2e-3)
    # exact softmax normalization -> rows sum to 1 within f32 rounding
    assert jnp.allclose(jnp.sum(out, axis=1), jnp.ones((batch,)), atol=2e-3)

    print("KERNEL_OK")
</pallas_src>

<mosaic_0001>
module attributes {stable_mosaic.version = 11 : i64} {
  func.func @mlp_kernel(%arg0: i32, %arg1: memref<8x13xf32, #tpu.memory_space<vmem>>, %arg2: memref<13x50xbf16, #tpu.memory_space<vmem>>, %arg3: memref<1x50xf32, #tpu.memory_space<vmem>>, %arg4: memref<50x50xbf16, #tpu.memory_space<vmem>>, %arg5: memref<1x50xf32, #tpu.memory_space<vmem>>, %arg6: memref<50x20xbf16, #tpu.memory_space<vmem>>, %arg7: memref<1x20xf32, #tpu.memory_space<vmem>>, %arg8: memref<20x5xbf16, #tpu.memory_space<vmem>>, %arg9: memref<1x5xf32, #tpu.memory_space<vmem>>, %arg10: memref<8x5xf32, #tpu.memory_space<vmem>>) attributes {dimension_semantics = [#tpu.dimension_semantics<parallel>], iteration_bounds = array<i64: 1>, scalar_prefetch = 0 : i64, scratch_operands = 0 : i64, tpu.core_type = #tpu.core_type<tc>, window_params = [{transform_indices = @transform_0, window_bounds = array<i64: 8, 13>}, {pipeline_mode = #tpu.pipeline_mode<synchronous>, transform_indices = @transform_1, window_bounds = array<i64: 13, 50>}, {pipeline_mode = #tpu.pipeline_mode<synchronous>, transform_indices = @transform_2, window_bounds = array<i64: 1, 50>}, {pipeline_mode = #tpu.pipeline_mode<synchronous>, transform_indices = @transform_3, window_bounds = array<i64: 50, 50>}, {pipeline_mode = #tpu.pipeline_mode<synchronous>, transform_indices = @transform_4, window_bounds = array<i64: 1, 50>}, {pipeline_mode = #tpu.pipeline_mode<synchronous>, transform_indices = @transform_5, window_bounds = array<i64: 50, 20>}, {pipeline_mode = #tpu.pipeline_mode<synchronous>, transform_indices = @transform_6, window_bounds = array<i64: 1, 20>}, {pipeline_mode = #tpu.pipeline_mode<synchronous>, transform_indices = @transform_7, window_bounds = array<i64: 20, 5>}, {pipeline_mode = #tpu.pipeline_mode<synchronous>, transform_indices = @transform_8, window_bounds = array<i64: 1, 5>}, {transform_indices = @transform_9, window_bounds = array<i64: 8, 5>}]} {
    %c0 = arith.constant 0 : index
    %c0_0 = arith.constant 0 : index
    %0 = vector.load %arg1[%c0, %c0_0] : memref<8x13xf32, #tpu.memory_space<vmem>>, vector<8x13xf32>
    %1 = arith.truncf %0 : vector<8x13xf32> to vector<8x13xbf16>
    %c0_1 = arith.constant 0 : index
    %c0_2 = arith.constant 0 : index
    %2 = vector.load %arg2[%c0_1, %c0_2] : memref<13x50xbf16, #tpu.memory_space<vmem>>, vector<13x50xbf16>
    %cst = arith.constant dense<0.000000e+00> : vector<8x50xf32>
    %3 = tpu.matmul %1, %2, %cst {dimension_numbers = #tpu.dot_dimension_numbers<[1], [0], [0], [1], [0, 0, 1, 1], [], []>} : vector<8x13xbf16>, vector<13x50xbf16>, vector<8x50xf32> -> vector<8x50xf32>
    %c0_3 = arith.constant 0 : index
    %c0_4 = arith.constant 0 : index
    %4 = vector.load %arg3[%c0_3, %c0_4] : memref<1x50xf32, #tpu.memory_space<vmem>>, vector<1x50xf32>
    %5 = vector.broadcast %4 : vector<1x50xf32> to vector<8x50xf32>
    %6 = arith.addf %3, %5 : vector<8x50xf32>
    %cst_5 = arith.constant 0.000000e+00 : f32
    %7 = vector.broadcast %cst_5 : f32 to vector<8x50xf32>
    %8 = arith.maximumf %6, %7 : vector<8x50xf32>
    %9 = arith.truncf %8 : vector<8x50xf32> to vector<8x50xbf16>
    %c0_6 = arith.constant 0 : index
    %c0_7 = arith.constant 0 : index
    %10 = vector.load %arg4[%c0_6, %c0_7] : memref<50x50xbf16, #tpu.memory_space<vmem>>, vector<50x50xbf16>
    %cst_8 = arith.constant dense<0.000000e+00> : vector<8x50xf32>
    %11 = tpu.matmul %9, %10, %cst_8 {dimension_numbers = #tpu.dot_dimension_numbers<[1], [0], [0], [1], [0, 0, 1, 1], [], []>} : vector<8x50xbf16>, vector<50x50xbf16>, vector<8x50xf32> -> vector<8x50xf32>
    %c0_9 = arith.constant 0 : index
    %c0_10 = arith.constant 0 : index
    %12 = vector.load %arg5[%c0_9, %c0_10] : memref<1x50xf32, #tpu.memory_space<vmem>>, vector<1x50xf32>
    %13 = vector.broadcast %12 : vector<1x50xf32> to vector<8x50xf32>
    %14 = arith.addf %11, %13 : vector<8x50xf32>
    %cst_11 = arith.constant 0.000000e+00 : f32
    %15 = vector.broadcast %cst_11 : f32 to vector<8x50xf32>
    %16 = arith.maximumf %14, %15 : vector<8x50xf32>
    %17 = arith.truncf %16 : vector<8x50xf32> to vector<8x50xbf16>
    %c0_12 = arith.constant 0 : index
    %c0_13 = arith.constant 0 : index
    %18 = vector.load %arg6[%c0_12, %c0_13] : memref<50x20xbf16, #tpu.memory_space<vmem>>, vector<50x20xbf16>
    %cst_14 = arith.constant dense<0.000000e+00> : vector<8x20xf32>
    %19 = tpu.matmul %17, %18, %cst_14 {dimension_numbers = #tpu.dot_dimension_numbers<[1], [0], [0], [1], [0, 0, 1, 1], [], []>} : vector<8x50xbf16>, vector<50x20xbf16>, vector<8x20xf32> -> vector<8x20xf32>
    %c0_15 = arith.constant 0 : index
    %c0_16 = arith.constant 0 : index
    %20 = vector.load %arg7[%c0_15, %c0_16] : memref<1x20xf32, #tpu.memory_space<vmem>>, vector<1x20xf32>
    %21 = vector.broadcast %20 : vector<1x20xf32> to vector<8x20xf32>
    %22 = arith.addf %19, %21 : vector<8x20xf32>
    %cst_17 = arith.constant 0.000000e+00 : f32
    %23 = vector.broadcast %cst_17 : f32 to vector<8x20xf32>
    %24 = arith.maximumf %22, %23 : vector<8x20xf32>
    %25 = arith.truncf %24 : vector<8x20xf32> to vector<8x20xbf16>
    %c0_18 = arith.constant 0 : index
    %c0_19 = arith.constant 0 : index
    %26 = vector.load %arg8[%c0_18, %c0_19] : memref<20x5xbf16, #tpu.memory_space<vmem>>, vector<20x5xbf16>
    %cst_20 = arith.constant dense<0.000000e+00> : vector<8x5xf32>
    %27 = tpu.matmul %25, %26, %cst_20 {dimension_numbers = #tpu.dot_dimension_numbers<[1], [0], [0], [1], [0, 0, 1, 1], [], []>} : vector<8x20xbf16>, vector<20x5xbf16>, vector<8x5xf32> -> vector<8x5xf32>
    %c0_21 = arith.constant 0 : index
    %c0_22 = arith.constant 0 : index
    %28 = vector.load %arg9[%c0_21, %c0_22] : memref<1x5xf32, #tpu.memory_space<vmem>>, vector<1x5xf32>
    %29 = vector.broadcast %28 : vector<1x5xf32> to vector<8x5xf32>
    %30 = arith.addf %27, %29 : vector<8x5xf32>
    %cst_23 = arith.constant dense<0xFF800000> : vector<8xf32>
    %31 = vector.multi_reduction <maximumf>, %30, %cst_23 [1] : vector<8x5xf32> to vector<8xf32>
    %32 = vector.shape_cast %31 : vector<8xf32> to vector<8x1xf32>
    %33 = vector.broadcast %32 : vector<8x1xf32> to vector<8x5xf32>
    %34 = arith.subf %30, %33 : vector<8x5xf32>
    %35 = math.exp %34 : vector<8x5xf32>
    %cst_24 = arith.constant dense<0.000000e+00> : vector<8xf32>
    %36 = vector.multi_reduction <add>, %35, %cst_24 [1] : vector<8x5xf32> to vector<8xf32>
    %37 = vector.shape_cast %36 : vector<8xf32> to vector<8x1xf32>
    %38 = vector.broadcast %37 : vector<8x1xf32> to vector<8x5xf32>
    %39 = arith.divf %35, %38 : vector<8x5xf32>
    %c0_25 = arith.constant 0 : index
    %c0_26 = arith.constant 0 : index
    %40 = vector.load %arg10[%c0_25, %c0_26] : memref<8x5xf32, #tpu.memory_space<vmem>>, vector<8x5xf32>
    tpu.vector_store %arg10[%c0_25, %c0_26], %39 {strides = array<i32>} : memref<8x5xf32, #tpu.memory_space<vmem>>, vector<8x5xf32>,
    return
  }
  func.func @transform_0(%arg0: i32) -> (i32, i32) {
    %c0_i32 = arith.constant 0 : i32
    %c0_i32_0 = arith.constant 0 : i32
    return %arg0, %c0_i32 : i32, i32
  }
  func.func @transform_1(%arg0: i32) -> (i32, i32) {
    %c0_i32 = arith.constant 0 : i32
    %c0_i32_0 = arith.constant 0 : i32
    %c0_i32_1 = arith.constant 0 : i32
    return %c0_i32, %c0_i32_0 : i32, i32
  }
  func.func @transform_2(%arg0: i32) -> (i32, i32) {
    %c0_i32 = arith.constant 0 : i32
    %c0_i32_0 = arith.constant 0 : i32
    %c0_i32_1 = arith.constant 0 : i32
    return %c0_i32, %c0_i32_0 : i32, i32
  }
  func.func @transform_3(%arg0: i32) -> (i32, i32) {
    %c0_i32 = arith.constant 0 : i32
    %c0_i32_0 = arith.constant 0 : i32
    %c0_i32_1 = arith.constant 0 : i32
    return %c0_i32, %c0_i32_0 : i32, i32
  }
  func.func @transform_4(%arg0: i32) -> (i32, i32) {
    %c0_i32 = arith.constant 0 : i32
    %c0_i32_0 = arith.constant 0 : i32
    %c0_i32_1 = arith.constant 0 : i32
    return %c0_i32, %c0_i32_0 : i32, i32
  }
  func.func @transform_5(%arg0: i32) -> (i32, i32) {
    %c0_i32 = arith.constant 0 : i32
    %c0_i32_0 = arith.constant 0 : i32
    %c0_i32_1 = arith.constant 0 : i32
    return %c0_i32, %c0_i32_0 : i32, i32
  }
  func.func @transform_6(%arg0: i32) -> (i32, i32) {
    %c0_i32 = arith.constant 0 : i32
    %c0_i32_0 = arith.constant 0 : i32
    %c0_i32_1 = arith.constant 0 : i32
    return %c0_i32, %c0_i32_0 : i32, i32
  }
  func.func @transform_7(%arg0: i32) -> (i32, i32) {
    %c0_i32 = arith.constant 0 : i32
    %c0_i32_0 = arith.constant 0 : i32
    %c0_i32_1 = arith.constant 0 : i32
    return %c0_i32, %c0_i32_0 : i32, i32
  }
  func.func @transform_8(%arg0: i32) -> (i32, i32) {
    %c0_i32 = arith.constant 0 : i32
    %c0_i32_0 = arith.constant 0 : i32
    %c0_i32_1 = arith.constant 0 : i32
    return %c0_i32, %c0_i32_0 : i32, i32
  }
  func.func @transform_9(%arg0: i32) -> (i32, i32) {
    %c0_i32 = arith.constant 0 : i32
    %c0_i32_0 = arith.constant 0 : i32
    return %arg0, %c0_i32 : i32, i32
  }
}

</mosaic_0001>

<bundles_post_ra>
// kernel: tpu_custom_call.1
= control target key start
LH: loop header
LB: loop body
LE: loop exit
PB: predicated region body
PF: predicated region fallthrough
CT: control target
= control target key end

     0   :  { %14 = vsyncpa [#allocation3], 0  ;;  %s494_s0 = inlined_call_operand.vmem [shape: f32[8,13], index: 0, kind: input, shape index: {}]   ;;  %s495_s1 = inlined_call_operand.vmem [shape: bf16[13,50], index: 1, kind: input, shape index: {}]   ;;  %s496_s2 = inlined_call_operand.vmem [shape: f32[1,50], index: 2, kind: input, shape index: {}]   ;;  %s497_s3 = inlined_call_operand.vmem [shape: bf16[50,50], index: 3, kind: input, shape index: {}]   ;;  %s498_s4 = inlined_call_operand.vmem [shape: f32[1,50], index: 4, kind: input, shape index: {}]   ;;  %s499_s5 = inlined_call_operand.vmem [shape: bf16[50,20], index: 5, kind: input, shape index: {}]   ;;  %s500_s6 = inlined_call_operand.hbm [shape: f32[1,20], index: 6, kind: input, shape index: {}]   ;;  %s501_s7 = inlined_call_operand.vmem [shape: bf16[20,5], index: 7, kind: input, shape index: {}]   ;;  %s502_s8 = inlined_call_operand.vmem [shape: f32[1,5], index: 8, kind: input, shape index: {}]   ;;  %s503_s9 = inlined_call_operand.hbm [shape: f32[8,5], index: 9, kind: output, shape index: {}]  }
   0x1   :  { %15 = vsyncpa [#allocation4], 0  ;;  %s33_s11 = sshll.u32 %s500_s6, 4  ;;  %s382_s12 = smov [#allocation2]   ;;  %s34_s11 = int_to_ptr.hbm [resolvable:$true] %s33_s11 }
   0x2   :  { %s35_s13 = sshll.u32 %s382_s12, 4  ;;  %s36_s13 = int_to_ptr.vmem [resolvable:$true] %s35_s13 }
   0x3   :  { %38 = dma.hbm_to_vmem [thread:$0]  %s34_s11, 16, %s36_s13, [#allocation3]  }
   0x4   :  { %378 = dma.done.wait [#allocation3], 16  }
   0x5   :  { %379 = vsyncadd [#allocation3], 4294967280  ;;  %vm65_vm0 = vcmask 1045504   ;;  %vm66_vm1 = vcmask 1046528   ;;  %v383_v0 = vmov 65535   ;;  %v48_v6 = vld [vmem:[%s494_s0] sm:$0xff] }
   0x6   :  { %v67_v1 = vsel %vm65_vm0, 4294967295, %v383_v0  ;;  %v277_v2 = vld [vmem:[%s495_s1] sm:$0xf]  ;;  %v311_v3 = vld [vmem:[%s495_s1] sm:$0x70]  ;;  %vm123_vm2 = vcmask 1040384   ;;  %v49_v10 = vpack.c.bf16 %v48_v6, %v48_v6 }
   0x7   :  { %v68_v4 = vsel %vm66_vm1, %v67_v1, 0  ;;  %v278_v5 = vor.u32 %v311_v3, %v277_v2  ;;  %v93_v7 = vld [vmem:[%s497_s3 + $0x18] sm:$0x1]  ;;  %vm61_vm3 = vcmask 105472   ;;  %v314_v13 = vld [vmem:[%s497_s3 + $0x10] sm:$0xff]  ;;  %v313_v14 = vld [vmem:[%s497_s3 + $0x8] sm:$0xff] }
   0x8   :  { %v111_v8 = vunpack.c.l.b16 %v93_v7  ;;  %v312_v15 = vld [vmem:[%s497_s3] sm:$0xff]  ;;  %v148_v16 = vld [vmem:[%s499_s5 + $0x18] sm:$0x1]  ;;  %v317_v20 = vld [vmem:[%s499_s5 + $0x10] sm:$0xff]  ;;  %vm119_vm4 = vcmask 408576   ;;  %vm215_vm5 = vcmask 1041408  }
   0x9   :  { %v70_v9 = vand.u32 %v278_v5, %v68_v4  ;;  %v166_v17 = vunpack.c.l.b16 %v148_v16  ;;  %v322_v21 = vld [vmem:[%s496_s2] ss:$0 sm:$0xff]  ;;  %v316_v27 = vld [vmem:[%s499_s5 + $0x8] sm:$0xff]  ;;  %vm211_vm6 = vcmask 162816   ;;  %vm232_vm7 = vcmask 39936   ;;  %s265_s19 = sshll.u32 %s503_s9, 4  ;;  %s266_s19 = int_to_ptr.hbm [resolvable:$true] %s265_s19 }
   0xa   :  { %v115_v11 = vpack.c.b16 %v111_v8, %v111_v8  ;;  %v315_v28 = vld [vmem:[%s499_s5] sm:$0xff]  ;;  %v197_v35 = vld [vmem:[%s501_s7 + $0x8] sm:$0x3] }
   0xb   :  { %79 = vmatpush.bf16.msra.mxu0 %v70_v9  ;;  %v170_v18 = vpack.c.b16 %v166_v17, %v166_v17  ;;  %v323_v29 = vld [vmem:[%s498_s4] ss:$0 sm:$0xff]  ;;  %v207_v36 = vunpack.c.l.b16 %v197_v35 }
   0xc   :  { %v125_v12 = vsel %vm123_vm2, %v115_v11, 0  ;;  %v318_v39 = vld [vmem:[%s501_s7] sm:$0xff]  ;;  %s384_s7 = smov [#allocation5]  }
   0xd   :  { %131 = vmatpush.bf16.msra.mxu1 %v125_v12  ;;  %v178_v19 = vsel %vm123_vm2, %v170_v18, 0  ;;  %v209_v37 = vpack.c.b16 %v207_v36, %v207_v36  ;;  %v324_v40 = vld [vmem:[#allocation2] ss:$0 sm:$0xff] }
   0xe   :  { %279 = vmatmul.msk.bf16.vlgmr.msra.gmra.mxu0 %vm61_vm3, %v49_v10  ;;  %184 = vmatpush.bf16.msra.mxu2 %v178_v19  ;;  %v325_v46 = vld [vmem:[%s502_s8] ss:$0 sm:$0xff]  ;;  %s263_s8 = sshll.u32 %s384_s7, 4  ;;  %s264_s8 = int_to_ptr.vmem [resolvable:$true] %s263_s8 }
   0xf   :  { %v217_v38 = vsel %vm215_vm5, %v209_v37, 0 }
  0x10   :  { %225 = vmatpush.bf16.msra.mxu3 %v217_v38 }
  0x11   :  { %132 = vmatpush.bf16.msra.mxu1 %v314_v13 }
  0x12   :  { %185 = vmatpush.bf16.msra.mxu2 %v317_v20 }
  0x14   :  { %226 = vmatpush.bf16.msra.mxu3 %v318_v39 }
  0x15   :  { %133 = vmatpush.bf16.msra.mxu1 %v313_v14 }
  0x16   :  { %186 = vmatpush.bf16.msra.mxu2 %v316_v27 }
  0x19   :  { %134 = vmatpush.bf16.msra.mxu1 %v312_v15 }
  0x1a   :  { %187 = vmatpush.bf16.msra.mxu2 %v315_v28 }
  0x8b   :  { %v81_v22 = vpop.f32.mrf.mxu0 }
  0x8c   :  { %v82_v23 = vadd.f32 %v322_v21, %v81_v22 }
  0x8e   :  { %v85_v24 = vmax.f32 %v82_v23, 0.0 }
  0x90   :  { %v86_v25 = vpack.c.bf16 %v85_v24, %v85_v24 }
  0x92   :  { %292 = vmatmul.msk.bf16.vlgmr.msra.gmra.mxu1 %vm119_vm4, %v86_v25 }
  0x93   :  { %v83_v26 = vpop.f32.mrf.mxu0 }
 0x10f   :  { %v136_v30 = vpop.f32.mrf.mxu1 }
 0x110   :  { %v137_v31 = vadd.f32 %v323_v29, %v136_v30 }
 0x112   :  { %v140_v32 = vmax.f32 %v137_v31, 0.0 }
 0x114   :  { %v141_v33 = vpack.c.bf16 %v140_v32, %v140_v32 }
 0x116   :  { %305 = vmatmul.msk.bf16.vlgmr.msra.gmra.mxu2 %vm119_vm4, %v141_v33 }
 0x117   :  { %v138_v34 = vpop.f32.mrf.mxu1 }
 0x199   :  { %v189_v41 = vpop.f32.mrf.mxu2 }
 0x19a   :  { %v190_v42 = vadd.f32 %v324_v40, %v189_v41 }
 0x19c   :  { %v193_v43 = vmax.f32 %v190_v42, 0.0 }
 0x19e   :  { %v194_v44 = vpack.c.bf16 %v193_v43, %v193_v43 }
 0x1a0   :  { %310 = vmatmul.msk.bf16.vlgmr.msra.gmra.mxu3 %vm211_vm6, %v194_v44 }
 0x1a1   :  { %v191_v45 = vpop.f32.mrf.mxu2 }
 0x223   :  { %v228_v47 = vpop.f32.mrf.mxu3 }
 0x224   :  { %v229_v48 = vadd.f32 %v325_v46, %v228_v47 }
 0x226   :  { %v233_v49 = vsel %vm232_vm7, %v229_v48, -inf }
 0x227   :  { %234 = vmax.xlane.f32.xlu0 %v233_v49 }
 0x22b   :  { %v230_v50 = vpop.f32.mrf.mxu3 }
 0x29a   :  { %v235_v51 = vpop.xlane.xlu0 %234 }
 0x29b   :  { %v236_v52 = vsub.f32 %v229_v48, %v235_v51 }
 0x29d   :  { %v237_v53 = vmul.f32 1.442695, %v236_v52 }
 0x29f   :  { %326 = vpow2.f32 %v237_v53 }
 0x2a5   :  { %v327_v54 = vpop.eup %326 }
 0x2a6   :  { %v239_v55 = vsel %vm232_vm7, %v327_v54, 0.0 }
 0x2a7   :  { %240 = vadd.xlane.f32.xlu0 %v239_v55 }
 0x31a   :  { %v241_v56 = vpop.xlane.xlu0 %240 }
 0x31b   :  { %328 = vrcp.f32 %v241_v56  ;;  %v253_v60 = vand.u32 2147483648, %v241_v56  ;;  %v251_v62 = vand.u32 2147483647, %v241_v56  ;;  %vm247_vm9 = vweird.f32 %v241_v56 }
 0x31d   :  { %v254_v0 = vor.u32 1.1754944e-38, %v253_v60  ;;  %vm252_vm11 = vcmp.eq.f32.partialorder %v251_v62, 8.507059e+37 }
 0x321   :  { %v329_v57 = vpop.eup %328 }
 0x322   :  { %v243_v58 = vmul.f32 %v329_v57, %v241_v56  ;;  %vm248_vm8 = vweird.f32 %v329_v57 }
 0x323   :  { %vm249_vm10 = vmor %vm247_vm9, %vm248_vm8 }
 0x324   :  { %v244_v59 = vsub.f32 1.0, %v243_v58 }
 0x326   :  { %v245_v61 = vmul.f32 %v329_v57, %v244_v59 }
 0x328   :  { %v246_v63 = vadd.f32 %v329_v57, %v245_v61 }
 0x32a   :  { %v250_v1 = vsel %vm249_vm10, %v329_v57, %v246_v63 }
 0x32b   :  { %v255_v2 = vsel %vm252_vm11, %v254_v0, %v250_v1 }
 0x32c   :  { %v256_v3 = vmul.f32 %v327_v54, %v255_v2 }
 0x32e   :  { %257 = vst.msk [vmem:[#allocation5] sm:$0xff] %vm232_vm7, %v256_v3 }
 0x32f   :  { %268 = dma.vmem_to_hbm [thread:$0]  %s264_s8, 128, %s266_s19, [#allocation4]  }
 0x330   :  { %380 = dma.done.wait [#allocation4], 128  }
 0x331   :  { %381 = vsyncadd [#allocation4], 4294967168 }
 0x332   :  { %273 = vsyncpa [#allocation3], 1 }
 0x333   :  { %274 = vsyncpa [#allocation4], 1 }

</bundles_post_ra>
